<compile_context>
chip_gen: v5e
topology: v5e:2x2
jax: 0.10.0
libtpu: 0.0.40
codegen_flags: <defaults>
</compile_context>

<pallas_src>
import math

import jax
import jax.numpy as jnp
from jax import lax
from jax.experimental import pallas as pl
from jax.experimental.pallas import tpu as pltpu

EPS = 1e-5      # nn.BatchNorm2d default eps
LANE = 128      # TPU lane width


# --------------------------------------------------------------------------- #
# Small helpers
# --------------------------------------------------------------------------- #
def _round_up(x, m):
    return (x + m - 1) // m * m


def _tile_bytes(shape, dtype):
    return math.prod(shape) * jnp.dtype(dtype).itemsize


_VMEM_CEILING = None


def _vmem_ceiling():
    # <=44 MiB on 64-MiB-VMEM chips (v7x), ~96 MiB on 128-MiB chips (v5e/v6e).
    global _VMEM_CEILING
    if _VMEM_CEILING is None:
        cap = 64 << 20
        try:
            cap = int(getattr(pltpu.get_tpu_info(), "vmem_capacity_bytes", cap))
        except Exception:
            pass
        _VMEM_CEILING = (96 << 20) if cap >= (100 << 20) else (44 << 20)
    return _VMEM_CEILING


def _vmem_limit(*, pipelined, constants=(), scratch=(), temporaries=(),
                single_buffer_consts=True):
    """Explicit VMEM budget: 2x double-buffered pipelined blocks, 1x (or 2x)
    constant-index blocks, scratch, in-kernel temporaries, 1.5x margin +
    8 MiB headroom, clamped to a per-generation ceiling."""
    px = 2 * sum(_tile_bytes(s, d) for s, d in pipelined)
    cx = (1 if single_buffer_consts else 2) * sum(
        _tile_bytes(s, d) for s, d in constants)
    sx = sum(_tile_bytes(s, d) for s, d in scratch)
    tx = sum(_tile_bytes(s, d) for s, d in temporaries)
    total = int(1.5 * (px + cx + sx + tx)) + (8 << 20)
    return int(min(max(total, 16 << 20), _vmem_ceiling()))


_SINGLE_BUFFER_OK = None


def _single_buffer_ok():
    """Probe whether pipeline_mode=pl.Buffered(1) is supported; cached."""
    global _SINGLE_BUFFER_OK
    if _SINGLE_BUFFER_OK is None:
        try:
            def k(x_ref, o_ref):
                o_ref[...] = x_ref[...] + 1.0
            x = jnp.zeros((8, 128), jnp.float32)
            jax.block_until_ready(pl.pallas_call(
                k, grid=(2,),
                in_specs=[pl.BlockSpec((8, 128), lambda i: (0, 0),
                                       pipeline_mode=pl.Buffered(1))],
                out_specs=pl.BlockSpec((8, 128), lambda i: (0, 0)),
                out_shape=jax.ShapeDtypeStruct((8, 128), jnp.float32),
            )(x))
            _SINGLE_BUFFER_OK = True
        except Exception:
            _SINGLE_BUFFER_OK = False
    return _SINGLE_BUFFER_OK


def _const_spec(shape):
    """BlockSpec for an operand whose block never changes across the grid
    (weights, folded BN scale/shift): single-buffer it when supported."""
    idx = lambda *_: (0,) * len(shape)
    if _single_buffer_ok():
        return pl.BlockSpec(shape, idx, pipeline_mode=pl.Buffered(1))
    return pl.BlockSpec(shape, idx)


def _pad_vec(v, c_p):
    return jnp.zeros((c_p,), jnp.float32).at[: v.shape[0]].set(v.astype(jnp.float32))


def _pack_1x1(w, cin_p, cout_p):                      # w: (cin, cout)
    cin, cout = w.shape
    wp = jnp.zeros((cin_p, cout_p), jnp.float32).at[:cin, :cout].set(w)
    return wp.astype(jnp.bfloat16)


def _pack_3x3(w, cin_p, cout_p):                      # w: (3, 3, cin, cout) HWIO
    cin, cout = w.shape[2], w.shape[3]
    wp = jnp.zeros((3, 3, cin_p, cout_p), jnp.float32).at[:, :, :cin, :cout].set(w)
    # K ordering is [kh][kw][cin] -- the kernel slices K per kh the same way.
    return wp.reshape(9 * cin_p, cout_p).astype(jnp.bfloat16)


def _bn_scale_shift(chan_sum, chan_sumsq, count, gamma_p, beta_p):
    # Training-mode BN (biased variance) folded to per-channel scale/shift.
    # NOTE: single-pass E[x^2]-mean^2 in f32 -- fine at these activation scales.
    mean = chan_sum / count
    var = jnp.maximum(chan_sumsq / count - mean * mean, 0.0)
    scale = gamma_p * lax.rsqrt(var + EPS)
    shift = beta_p - mean * scale
    return scale.reshape(1, -1), shift.reshape(1, -1)


def _pick_b_tile(N, H, W, c_max_p):
    """Batch-elements per grid step: fit VMEM, prefer >=512 MXU rows, and keep
    >=4 grid steps (2 per v7x TensorCore) when the batch allows it."""
    per_b = H * W * c_max_p * 48          # rough bytes / batch elem / stage
    budget = _vmem_ceiling() - (8 << 20)
    fits = [d for d in range(1, N + 1) if N % d == 0 and d * per_b <= budget]
    if not fits:
        return 1
    good = [d for d in fits if d * H * W >= 512]
    pref = [d for d in good if N // d >= 4]
    if pref:
        return max(pref)
    if good:
        return min(good)
    return max(fits)


# --------------------------------------------------------------------------- #
# Pallas kernel 1: per-tile channel sum / sum-of-squares (for BN statistics)
# --------------------------------------------------------------------------- #
def _channel_stats_kernel(x_ref, s_ref):
    v = x_ref[...].astype(jnp.float32)
    v = v.reshape(-1, v.shape[-1])                    # (H*B*W, C)
    s_ref[...] = jnp.concatenate(
        [jnp.sum(v, axis=0, keepdims=True),
         jnp.sum(v * v, axis=0, keepdims=True)], axis=0)[None]


def _channel_stats(x, b_tile):
    """Per-channel (sum, sumsq) over (H, N, W) via a parallel Pallas reduction."""
    H, N, W, C = x.shape
    steps = N // b_tile
    vmem = _vmem_limit(
        pipelined=[((H, b_tile, W, C), x.dtype), ((1, 2, C), jnp.float32)],
        temporaries=[((H * b_tile * W, C), jnp.float32)])
    partial = pl.pallas_call(
        _channel_stats_kernel,
        grid=(steps,),
        in_specs=[pl.BlockSpec((H, b_tile, W, C), lambda n: (0, n, 0, 0))],
        out_specs=pl.BlockSpec((1, 2, C), lambda n: (n, 0, 0)),
        out_shape=jax.ShapeDtypeStruct((steps, 2, C), jnp.float32),
        compiler_params=pltpu.CompilerParams(
            dimension_semantics=("parallel",),
            vmem_limit_bytes=vmem),
    )(x)
    s = jnp.sum(partial, axis=0)                      # (2, C) -- tiny, XLA
    return s[0], s[1]


# --------------------------------------------------------------------------- #
# Pallas kernel 2: one residual stage (BN/ReLU -> conv [-> stats] [-> +shortcut])
# --------------------------------------------------------------------------- #
def _make_stage_kernel(*, H, W, B, Cin, Cout, Cx, ksize, emit_stats,
                       stats_after_shortcut, shortcut):
    """Per (B-tile of) batch elements, layout (H, B, W, C):
         y    = relu(h_in * scale + shift)           (folded BN + ReLU, f32)
         acc  = 3x3 conv as 3 accumulating MXU matmuls over a haloed scratch
                (K = 3*Cin per kh), or one matmul for 1x1
         acc += shortcut (identity x, or 1x1 conv of pre-activated x)
       optionally emits per-tile channel sum / sumsq of acc."""
    M = H * B * W

    def kernel(*refs):
        it = iter(refs)
        hin_ref = next(it); scale_ref = next(it); shift_ref = next(it)
        w_ref = next(it)
        x_ref = scp_ref = shp_ref = wsc_ref = None
        if shortcut == "projection":
            x_ref = next(it); scp_ref = next(it); shp_ref = next(it)
            wsc_ref = next(it)
        elif shortcut == "identity":
            x_ref = next(it)
        out_ref = next(it)
        st_ref = next(it) if emit_stats else None
        scr_ref = next(it) if ksize == 3 else None

        # -------- folded BatchNorm + ReLU (f32 VPU math) --------
        y = jnp.maximum(
            hin_ref[...].astype(jnp.float32) * scale_ref[...] + shift_ref[...],
            0.0)
        yb = y.astype(jnp.bfloat16)                   # (H, B, W, Cin) MXU operand

        # -------- convolution --------
        if ksize == 3:
            # Re-zero the halo every step (2 rows + 2 cols -> cheap, and keeps
            # the kernel correct under any megacore partitioning of the grid).
            zrow = jnp.zeros((1, B, W, 3 * Cin), jnp.bfloat16)
            scr_ref[0:1, :, :, :] = zrow
            scr_ref[H + 1:H + 2, :, :, :] = zrow
            zcol = jnp.zeros((H, B, 1, Cin), jnp.bfloat16)
            scr_ref[1:H + 1, :, 0:1, 0:Cin] = zcol
            scr_ref[1:H + 1, :, W - 1:W, 2 * Cin:3 * Cin] = zcol
            # Write the three W-shifted copies of yb into the 3 lane groups.
            scr_ref[1:H + 1, :, 1:W, 0:Cin] = yb[:, :, 0:W - 1, :]          # kw=0
            scr_ref[1:H + 1, :, :, Cin:2 * Cin] = yb                        # kw=1
            scr_ref[1:H + 1, :, 0:W - 1, 2 * Cin:3 * Cin] = yb[:, :, 1:W, :]  # kw=2

            # 3 accumulating MXU matmuls, K = 3*Cin (v6e/v7x MXU kept full;
            # accumulation maps onto the v7x MRB).
            acc = None
            for kh in range(3):
                lhs = scr_ref[kh:kh + H, :, :, :].reshape(M, 3 * Cin)
                part = jnp.dot(lhs, w_ref[kh * 3 * Cin:(kh + 1) * 3 * Cin, :],
                               preferred_element_type=jnp.float32)
                acc = part if acc is None else acc + part
        else:
            acc = jnp.dot(yb.reshape(M, Cin), w_ref[...],
                          preferred_element_type=jnp.float32)

        def write_stats(a):
            st_ref[...] = jnp.concatenate(
                [jnp.sum(a, axis=0, keepdims=True),
                 jnp.sum(a * a, axis=0, keepdims=True)], axis=0)[None]

        if emit_stats and not stats_after_shortcut:
            write_stats(acc)

        # -------- shortcut folded straight into the accumulator --------
        if shortcut == "projection":
            ysc = jnp.maximum(
                x_ref[...].astype(jnp.float32) * scp_ref[...] + shp_ref[...],
                0.0)
            acc = acc + jnp.dot(ysc.astype(jnp.bfloat16).reshape(M, Cx),
                                wsc_ref[...],
                                preferred_element_type=jnp.float32)
        elif shortcut == "identity":
            acc = acc + x_ref[...].astype(jnp.float32).reshape(M, Cout)

        if emit_stats and stats_after_shortcut:
            write_stats(acc)

        out_ref[...] = acc.reshape(H, B, W, Cout).astype(out_ref.dtype)

    return kernel


def _conv_stage(hin, scale, shift, w_packed, *, ksize, cout_p, b_tile,
                emit_stats=False, stats_after_shortcut=False,
                shortcut=None, x=None, scale_pre=None, shift_pre=None,
                wsc=None, out_dtype=jnp.bfloat16):
    H, N, W, cin_p = hin.shape
    assert N % b_tile == 0
    steps = N // b_tile
    cx = x.shape[-1] if x is not None else 0
    if shortcut == "identity":
        assert cx == cout_p, "identity shortcut requires matching padded channels"

    kernel = _make_stage_kernel(H=H, W=W, B=b_tile, Cin=cin_p, Cout=cout_p,
                                Cx=cx, ksize=ksize, emit_stats=emit_stats,
                                stats_after_shortcut=stats_after_shortcut,
                                shortcut=shortcut)

    def act_spec(c):
        return pl.BlockSpec((H, b_tile, W, c), lambda n: (0, n, 0, 0))

    args = [hin, scale, shift, w_packed]
    in_specs = [act_spec(cin_p), _const_spec(scale.shape),
                _const_spec(shift.shape), _const_spec(w_packed.shape)]
    pipelined = [((H, b_tile, W, cin_p), hin.dtype)]
    constants = [(scale.shape, jnp.float32), (shift.shape, jnp.float32),
                 (w_packed.shape, w_packed.dtype)]

    if shortcut == "projection":
        args += [x, scale_pre, shift_pre, wsc]
        in_specs += [act_spec(cx), _const_spec(scale_pre.shape),
                     _const_spec(shift_pre.shape), _const_spec(wsc.shape)]
        pipelined += [((H, b_tile, W, cx), x.dtype)]
        constants += [(scale_pre.shape, jnp.float32),
                      (shift_pre.shape, jnp.float32),
                      (wsc.shape, wsc.dtype)]
    elif shortcut == "identity":
        args += [x]
        in_specs += [act_spec(cx)]
        pipelined += [((H, b_tile, W, cx), x.dtype)]

    out_shapes = [jax.ShapeDtypeStruct((H, N, W, cout_p), out_dtype)]
    out_specs = [act_spec(cout_p)]
    pipelined += [((H, b_tile, W, cout_p), out_dtype)]
    if emit_stats:
        out_shapes.append(jax.ShapeDtypeStruct((steps, 2, cout_p), jnp.float32))
        out_specs.append(pl.BlockSpec((1, 2, cout_p), lambda n: (n, 0, 0)))
        pipelined += [((1, 2, cout_p), jnp.float32)]

    scratch_shapes, scratch = [], []
    if ksize == 3:
        scratch_shapes = [pltpu.VMEM((H + 2, b_tile, W, 3 * cin_p), jnp.bfloat16)]
        scratch = [((H + 2, b_tile, W, 3 * cin_p), jnp.bfloat16)]

    M = H * b_tile * W
    temporaries = [((M, cin_p), jnp.float32),      # BN+ReLU value
                   ((M, cin_p), jnp.bfloat16),     # bf16 MXU operand
                   ((M, cout_p), jnp.float32),     # f32 accumulator
                   ((M, cout_p), jnp.float32)]     # second live accumulator
    if ksize == 3:
        temporaries += [((M, 3 * cin_p), jnp.bfloat16)] * 2   # per-kh LHS values
    if shortcut == "projection":
        temporaries += [((M, cx), jnp.float32), ((M, cx), jnp.bfloat16)]
    elif shortcut == "identity":
        temporaries += [((M, cx), jnp.float32)]

    vmem = _vmem_limit(pipelined=pipelined, constants=constants,
                       scratch=scratch, temporaries=temporaries,
                       single_buffer_consts=_single_buffer_ok())

    return pl.pallas_call(
        kernel,
        grid=(steps,),
        in_specs=in_specs,
        out_specs=tuple(out_specs) if emit_stats else out_specs[0],
        out_shape=tuple(out_shapes) if emit_stats else out_shapes[0],
        scratch_shapes=scratch_shapes,
        compiler_params=pltpu.CompilerParams(
            dimension_semantics=("parallel",),
            vmem_limit_bytes=vmem),
    )(*args)


# --------------------------------------------------------------------------- #
# BlockV2 forward (wrapper: layout, channel padding, weight packing, BN folds)
# --------------------------------------------------------------------------- #
def block_v2_pallas(x_nchw, p, *, bottleneck, stride=1, return_out_stats=False):
    assert stride == 1  # TODO(synk): strided conv / strided projection not implemented.
    N, Cin, H, W = x_nchw.shape
    use_projection = "wsc" in p
    Mtot = N * H * W

    if not bottleneck:
        Cmid, Cout = p["w1"].shape[-1], p["w2"].shape[-1]
    else:
        Cmid, Cout = p["w1"].shape[-1], p["w3"].shape[-1]
    cin_p, cmid_p, cout_p = (_round_up(c, LANE) for c in (Cin, Cmid, Cout))

    # NCHW -> (H, N, W, C): channels on lanes (zero-padded to 128), W on
    # sublanes; carried in bf16 for DMA.  XLA fuses transpose + pad + cast
    # into one pass over x.
    x = jnp.transpose(x_nchw, (2, 0, 3, 1))
    x_p = jnp.pad(x, ((0, 0), (0, 0), (0, 0), (0, cin_p - Cin))).astype(jnp.bfloat16)

    b_tile = _pick_b_tile(N, H, W, max(cin_p, cmid_p, cout_p))

    # Pre-activation BN: global batch stats (Pallas reduction) -> scale/shift.
    s0, ss0 = _channel_stats(x_p, b_tile)
    scale_pre, shift_pre = _bn_scale_shift(
        s0, ss0, Mtot, _pad_vec(p["g_pre"], cin_p), _pad_vec(p["b_pre"], cin_p))

    wsc_p = _pack_1x1(p["wsc"], cin_p, cout_p) if use_projection else None
    sc_kind = "projection" if use_projection else "identity"
    sc_kwargs = dict(shortcut=sc_kind, x=x_p, scale_pre=scale_pre,
                     shift_pre=shift_pre, wsc=wsc_p, out_dtype=jnp.float32,
                     emit_stats=return_out_stats, stats_after_shortcut=True)

    if not bottleneck:
        w1_p = _pack_3x3(p["w1"], cin_p, cmid_p)
        w2_p = _pack_3x3(p["w2"], cmid_p, cout_p)

        h1, st1 = _conv_stage(x_p, scale_pre, shift_pre, w1_p, ksize=3,
                              cout_p=cmid_p, b_tile=b_tile, emit_stats=True)
        s1 = jnp.sum(st1, axis=0)
        scale_a, shift_a = _bn_scale_shift(
            s1[0], s1[1], Mtot, _pad_vec(p["g_a"], cmid_p), _pad_vec(p["b_a"], cmid_p))

        res = _conv_stage(h1, scale_a, shift_a, w2_p, ksize=3,
                          cout_p=cout_p, b_tile=b_tile, **sc_kwargs)
    else:
        w1_p = _pack_1x1(p["w1"], cin_p, cmid_p)
        w2_p = _pack_3x3(p["w2"], cmid_p, cmid_p)
        w3_p = _pack_1x1(p["w3"], cmid_p, cout_p)

        h1, st1 = _conv_stage(x_p, scale_pre, shift_pre, w1_p, ksize=1,
                              cout_p=cmid_p, b_tile=b_tile, emit_stats=True)
        s1 = jnp.sum(st1, axis=0)
        scale_a, shift_a = _bn_scale_shift(
            s1[0], s1[1], Mtot, _pad_vec(p["g_a"], cmid_p), _pad_vec(p["b_a"], cmid_p))

        h2, st2 = _conv_stage(h1, scale_a, shift_a, w2_p, ksize=3,
                              cout_p=cmid_p, b_tile=b_tile, emit_stats=True)
        s2 = jnp.sum(st2, axis=0)
        scale_b, shift_b = _bn_scale_shift(
            s2[0], s2[1], Mtot, _pad_vec(p["g_b"], cmid_p), _pad_vec(p["b_b"], cmid_p))

        res = _conv_stage(h2, scale_b, shift_b, w3_p, ksize=1,
                          cout_p=cout_p, b_tile=b_tile, **sc_kwargs)

    if return_out_stats:
        out_p, st_out = res
    else:
        out_p = res

    out = out_p[..., :Cout]                           # drop padded channels
    out_nchw = jnp.transpose(out, (1, 3, 0, 2))       # (H,N,W,C) -> NCHW
    if return_out_stats:
        return out_nchw, jnp.sum(st_out, axis=0)
    return out_nchw


# --------------------------------------------------------------------------- #
# Pure-JAX reference (f32 ground truth for correctness check only)
# --------------------------------------------------------------------------- #
def block_v2_reference(x_nchw, p, *, bottleneck):
    x = jnp.transpose(x_nchw, (0, 2, 3, 1)).astype(jnp.float32)

    def bn_relu(v, g, b):
        mu = jnp.mean(v, axis=(0, 1, 2), keepdims=True)
        var = jnp.mean((v - mu) ** 2, axis=(0, 1, 2), keepdims=True)
        vn = (v - mu) / jnp.sqrt(var + EPS)
        return jnp.maximum(vn * g.reshape(1, 1, 1, -1) + b.reshape(1, 1, 1, -1), 0.0)

    def conv(v, w):
        if w.ndim == 2:
            w = w.reshape(1, 1, *w.shape)
        pad = (w.shape[0] - 1) // 2
        return jax.lax.conv_general_dilated(
            v, w, window_strides=(1, 1),
            padding=((pad, pad), (pad, pad)),
            dimension_numbers=('NHWC', 'HWIO', 'NHWC'))

    y = bn_relu(x, p['g_pre'], p['b_pre'])
    short = conv(y, p['wsc']) if 'wsc' in p else x
    if not bottleneck:
        h = conv(y, p['w1'])
        h = bn_relu(h, p['g_a'], p['b_a'])
        h = conv(h, p['w2'])
    else:
        h = conv(y, p['w1'])
        h = bn_relu(h, p['g_a'], p['b_a'])
        h = conv(h, p['w2'])
        h = bn_relu(h, p['g_b'], p['b_b'])
        h = conv(h, p['w3'])
    return jnp.transpose(h + short, (0, 3, 1, 2))


# --------------------------------------------------------------------------- #
# Deterministic parameter construction (same shapes as the nn.Module __init__)
# --------------------------------------------------------------------------- #
def make_params(key, in_channels, channels, *, bottleneck, stride=1):
    div = 4 if bottleneck else 1
    cm = channels // div

    def nrm(key, shape, scale=0.1):
        key, sub = jax.random.split(key)
        return key, jax.random.normal(sub, shape, jnp.float32) * scale

    p = {}
    key, g = nrm(key, (in_channels,)); p['g_pre'] = 1.0 + g
    key, p['b_pre'] = nrm(key, (in_channels,))
    if not bottleneck:
        key, p['w1'] = nrm(key, (3, 3, in_channels, cm), 0.2)       # HWIO
        key, g = nrm(key, (cm,)); p['g_a'] = 1.0 + g
        key, p['b_a'] = nrm(key, (cm,))
        key, p['w2'] = nrm(key, (3, 3, cm, channels), 0.2)
    else:
        key, p['w1'] = nrm(key, (in_channels, cm), 0.2)             # 1x1 as (Cin, Cout)
        key, g = nrm(key, (cm,)); p['g_a'] = 1.0 + g
        key, p['b_a'] = nrm(key, (cm,))
        key, p['w2'] = nrm(key, (3, 3, cm, cm), 0.2)
        key, g = nrm(key, (cm,)); p['g_b'] = 1.0 + g
        key, p['b_b'] = nrm(key, (cm,))
        key, p['w3'] = nrm(key, (cm, channels), 0.2)
    if stride != 1 or in_channels != channels:                       # use_projection
        key, p['wsc'] = nrm(key, (in_channels, channels), 0.2)
    return key, p


# --------------------------------------------------------------------------- #
if __name__ == "__main__":
    key = jax.random.PRNGKey(0)
    N, H, W = 2, 16, 16

    def rel_err(a, b):
        a = a.astype(jnp.float32); b = b.astype(jnp.float32)
        return float(jnp.linalg.norm(a - b) / (jnp.linalg.norm(b) + 1e-12))

    # Case 1: basic block, in_channels != channels -> projection shortcut.
    Cin1, Cch1 = 4, 8
    key, p1 = make_params(key, Cin1, Cch1, bottleneck=False, stride=1)
    key, sub = jax.random.split(key)
    x1 = jax.random.normal(sub, (N, Cin1, H, W), jnp.float32)
    out1 = jax.block_until_ready(block_v2_pallas(x1, p1, bottleneck=False, stride=1))
    ref1 = block_v2_reference(x1, p1, bottleneck=False)
    assert out1.shape == (N, Cch1, H, W)
    e1 = rel_err(out1, ref1)
    # bf16 activations + MXU operands (f32 accumulation) -> relative L2 check.
    assert e1 < 2e-2, f"basic block mismatch (rel L2 err {e1:.3e})"

    # Case 2: bottleneck block, in_channels == channels -> identity shortcut.
    Cin2, Cch2 = 8, 8
    key, p2 = make_params(key, Cin2, Cch2, bottleneck=True, stride=1)
    key, sub = jax.random.split(key)
    x2 = jax.random.normal(sub, (N, Cin2, H, W), jnp.float32)
    out2 = jax.block_until_ready(block_v2_pallas(x2, p2, bottleneck=True, stride=1))
    ref2 = block_v2_reference(x2, p2, bottleneck=True)
    assert out2.shape == (N, Cch2, H, W)
    e2 = rel_err(out2, ref2)
    assert e2 < 2e-2, f"bottleneck block mismatch (rel L2 err {e2:.3e})"

    print("KERNEL_OK")
</pallas_src>

<mosaic_0001>
module attributes {stable_mosaic.version = 11 : i64} {
  func.func @_channel_stats_kernel(%arg0: i32, %arg1: memref<16x2x16x128xbf16, #tpu.memory_space<vmem>>, %arg2: memref<1x2x128xf32, #tpu.memory_space<vmem>>) attributes {dimension_semantics = [#tpu.dimension_semantics<parallel>], iteration_bounds = array<i64: 1>, scalar_prefetch = 0 : i64, scratch_operands = 0 : i64, tpu.core_type = #tpu.core_type<tc>, window_params = [{transform_indices = @transform_0, window_bounds = array<i64: 16, 2, 16, 128>}, {transform_indices = @transform_1, window_bounds = array<i64: 1, 2, 128>}]} {
    %c0 = arith.constant 0 : index
    %c0_0 = arith.constant 0 : index
    %c0_1 = arith.constant 0 : index
    %c0_2 = arith.constant 0 : index
    %0 = vector.load %arg1[%c0, %c0_0, %c0_1, %c0_2] : memref<16x2x16x128xbf16, #tpu.memory_space<vmem>>, vector<16x2x16x128xbf16>
    %1 = arith.extf %0 : vector<16x2x16x128xbf16> to vector<16x2x16x128xf32>
    %2 = vector.shape_cast %1 : vector<16x2x16x128xf32> to vector<512x128xf32>
    %cst = arith.constant dense<0.000000e+00> : vector<128xf32>
    %3 = vector.multi_reduction <add>, %2, %cst [0] : vector<512x128xf32> to vector<128xf32>
    %4 = vector.shape_cast %3 : vector<128xf32> to vector<1x128xf32>
    %5 = arith.mulf %2, %2 : vector<512x128xf32>
    %cst_3 = arith.constant dense<0.000000e+00> : vector<128xf32>
    %6 = vector.multi_reduction <add>, %5, %cst_3 [0] : vector<512x128xf32> to vector<128xf32>
    %7 = vector.shape_cast %6 : vector<128xf32> to vector<1x128xf32>
    %8 = tpu.concatenate %4, %7 in 0 : vector<1x128xf32>, vector<1x128xf32> -> vector<2x128xf32>
    %9 = vector.shape_cast %8 : vector<2x128xf32> to vector<1x2x128xf32>
    %c0_4 = arith.constant 0 : index
    %c0_5 = arith.constant 0 : index
    %c0_6 = arith.constant 0 : index
    %10 = vector.load %arg2[%c0_4, %c0_5, %c0_6] : memref<1x2x128xf32, #tpu.memory_space<vmem>>, vector<1x2x128xf32>
    tpu.vector_store %arg2[%c0_4, %c0_5, %c0_6], %9 {strides = array<i32>} : memref<1x2x128xf32, #tpu.memory_space<vmem>>, vector<1x2x128xf32>,
    return
  }
  func.func @transform_0(%arg0: i32) -> (i32, i32, i32, i32) {
    %c0_i32 = arith.constant 0 : i32
    %c0_i32_0 = arith.constant 0 : i32
    %c0_i32_1 = arith.constant 0 : i32
    %c0_i32_2 = arith.constant 0 : i32
    return %c0_i32, %arg0, %c0_i32_0, %c0_i32_1 : i32, i32, i32, i32
  }
  func.func @transform_1(%arg0: i32) -> (i32, i32, i32) {
    %c0_i32 = arith.constant 0 : i32
    %c0_i32_0 = arith.constant 0 : i32
    %c0_i32_1 = arith.constant 0 : i32
    return %arg0, %c0_i32, %c0_i32_0 : i32, i32, i32
  }
}

</mosaic_0001>

<bundles_post_ra>
// kernel: tpu_custom_call.1
= control target key start
LH: loop header
LB: loop body
LE: loop exit
PB: predicated region body
PF: predicated region fallthrough
CT: control target
= control target key end

     0   :  { %6 = vsyncpa [#allocation3], 0  ;;  %s610_s0 = inlined_call_operand.hbm [shape: bf16[16,2,16,128], index: 0, kind: input, shape index: {}]   ;;  %s611_s1 = inlined_call_operand.hbm [shape: f32[1,2,128], index: 1, kind: output, shape index: {}]  }
   0x1   :  { %7 = vsyncpa [#allocation4], 0  ;;  %s12_s8 = sshll.u32 %s610_s0, 4  ;;  %s590_s9 = smov [#allocation2]   ;;  %s13_s8 = int_to_ptr.hbm [resolvable:$true] %s12_s8 }
   0x2   :  { %s14_s10 = sshll.u32 %s590_s9, 4  ;;  %s591_s11 = smov 64   ;;  %s15_s10 = int_to_ptr.vmem [resolvable:$true] %s14_s10 }
   0x3   :  { %s592_s12 = smov 4  }
   0x4   :  { %20 = dma.hbm_to_vmem [thread:$0]  %s13_s8, 4096, %s15_s10, [#allocation3], %s591_s11, %s591_s11, %s592_s12  }
   0x5   :  { %586 = dma.done.wait [#allocation3], 4096  }
   0x6   :  { %587 = vsyncadd [#allocation3], 4294963200  ;;  %v376_v0 = vld [vmem:[#allocation2] sm:$0xff]   ;;  %v503_v1 = vld [vmem:[#allocation2 + $0x8] sm:$0xff]   ;;  %s593_s0 = smov [#allocation5]   ;;  %s365_s16 = sshll.u32 %s611_s1, 4  ;;  %s366_s16 = int_to_ptr.hbm [resolvable:$true] %s365_s16 }
   0x7   :  { %v377_v2 = vunpack.c.l.bf16 %v376_v0  ;;  %v378_v3 = vunpack.c.h.bf16 %v376_v0  ;;  %v381_v4 = vunpack.c.l.bf16 %v503_v1  ;;  %v504_v5 = vld [vmem:[#allocation2 + $0x10] sm:$0xff]   ;;  %v382_v7 = vunpack.c.h.bf16 %v503_v1  ;;  %v505_v13 = vld [vmem:[#allocation2 + $0x18] sm:$0xff]   ;;  %v506_v22 = vld [vmem:[#allocation2 + $0x20] sm:$0xff]   ;;  %s363_s13 = sshll.u32 %s593_s0, 4  ;;  %s364_s13 = int_to_ptr.vmem [resolvable:$true] %s363_s13 }
   0x8   :  { %v385_v11 = vunpack.c.l.bf16 %v504_v5  ;;  %v386_v15 = vunpack.c.h.bf16 %v504_v5  ;;  %v389_v19 = vunpack.c.l.bf16 %v505_v13  ;;  %v390_v24 = vunpack.c.h.bf16 %v505_v13  ;;  %v507_v31 = vld [vmem:[#allocation2 + $0x28] sm:$0xff]   ;;  %v508_v40 = vld [vmem:[#allocation2 + $0x30] sm:$0xff]   ;;  %v509_v49 = vld [vmem:[#allocation2 + $0x38] sm:$0xff]  }
   0x9   :  { %v153_v6 = vadd.f32 %v378_v3, %v377_v2  ;;  %v222_v8 = vmul.f32 %v377_v2, %v377_v2  ;;  %v223_v9 = vmul.f32 %v378_v3, %v378_v3  ;;  %v224_v12 = vmul.f32 %v381_v4, %v381_v4  ;;  %v510_v58 = vld [vmem:[#allocation2 + $0x40] sm:$0xff]   ;;  %v511_v3 = vld [vmem:[#allocation2 + $0x48] sm:$0xff]  }
   0xa   :  { %v225_v16 = vmul.f32 %v382_v7, %v382_v7  ;;  %v226_v20 = vmul.f32 %v385_v11, %v385_v11  ;;  %v227_v25 = vmul.f32 %v386_v15, %v386_v15  ;;  %v393_v28 = vunpack.c.l.bf16 %v506_v22 }
   0xb   :  { %v154_v10 = vadd.f32 %v381_v4, %v153_v6  ;;  %v286_v17 = vadd.f32 %v223_v9, %v222_v8  ;;  %v228_v29 = vmul.f32 %v389_v19, %v389_v19  ;;  %v394_v33 = vunpack.c.h.bf16 %v506_v22 }
   0xc   :  { %v229_v34 = vmul.f32 %v390_v24, %v390_v24  ;;  %v397_v37 = vunpack.c.l.bf16 %v507_v31  ;;  %v230_v38 = vmul.f32 %v393_v28, %v393_v28  ;;  %v398_v42 = vunpack.c.h.bf16 %v507_v31 }
   0xd   :  { %v155_v14 = vadd.f32 %v382_v7, %v154_v10  ;;  %v287_v21 = vadd.f32 %v286_v17, %v224_v12  ;;  %v231_v43 = vmul.f32 %v394_v33, %v394_v33  ;;  %v401_v46 = vunpack.c.l.bf16 %v508_v40  ;;  %v512_v12 = vld [vmem:[#allocation2 + $0x50] sm:$0xff]  }
   0xe   :  { %v232_v47 = vmul.f32 %v397_v37, %v397_v37  ;;  %v402_v51 = vunpack.c.h.bf16 %v508_v40  ;;  %v233_v52 = vmul.f32 %v398_v42, %v398_v42  ;;  %v405_v55 = vunpack.c.l.bf16 %v509_v49 }
   0xf   :  { %v156_v18 = vadd.f32 %v385_v11, %v155_v14  ;;  %v288_v26 = vadd.f32 %v287_v21, %v225_v16  ;;  %v234_v56 = vmul.f32 %v401_v46, %v401_v46  ;;  %v406_v60 = vunpack.c.h.bf16 %v509_v49  ;;  %v513_v21 = vld [vmem:[#allocation2 + $0x58] sm:$0xff]  }
  0x10   :  { %v235_v61 = vmul.f32 %v402_v51, %v402_v51  ;;  %v409_v0 = vunpack.c.l.bf16 %v510_v58  ;;  %v236_v1 = vmul.f32 %v405_v55, %v405_v55  ;;  %v410_v5 = vunpack.c.h.bf16 %v510_v58 }
  0x11   :  { %v157_v23 = vadd.f32 %v386_v15, %v156_v18  ;;  %v289_v30 = vadd.f32 %v288_v26, %v226_v20  ;;  %v237_v6 = vmul.f32 %v406_v60, %v406_v60  ;;  %v413_v9 = vunpack.c.l.bf16 %v511_v3 }
  0x12   :  { %v238_v10 = vmul.f32 %v409_v0, %v409_v0  ;;  %v414_v14 = vunpack.c.h.bf16 %v511_v3  ;;  %v239_v15 = vmul.f32 %v410_v5, %v410_v5  ;;  %v417_v18 = vunpack.c.l.bf16 %v512_v12 }
  0x13   :  { %v158_v27 = vadd.f32 %v389_v19, %v157_v23  ;;  %v290_v35 = vadd.f32 %v289_v30, %v227_v25  ;;  %v240_v19 = vmul.f32 %v413_v9, %v413_v9  ;;  %v418_v23 = vunpack.c.h.bf16 %v512_v12  ;;  %v514_v30 = vld [vmem:[#allocation2 + $0x60] sm:$0xff]  }
  0x14   :  { %vm355_vm0 = vcmask 1040384  }
  0x15   :  { %v159_v32 = vadd.f32 %v390_v24, %v158_v27  ;;  %v291_v39 = vadd.f32 %v290_v35, %v228_v29  ;;  %v241_v24 = vmul.f32 %v414_v14, %v414_v14  ;;  %v421_v27 = vunpack.c.l.bf16 %v513_v21 }
  0x17   :  { %v160_v36 = vadd.f32 %v393_v28, %v159_v32  ;;  %v292_v44 = vadd.f32 %v291_v39, %v229_v34  ;;  %v242_v28 = vmul.f32 %v417_v18, %v417_v18  ;;  %v422_v32 = vunpack.c.h.bf16 %v513_v21  ;;  %v515_v39 = vld [vmem:[#allocation2 + $0x68] sm:$0xff]  }
  0x19   :  { %v161_v41 = vadd.f32 %v394_v33, %v160_v36  ;;  %v293_v48 = vadd.f32 %v292_v44, %v230_v38  ;;  %v243_v33 = vmul.f32 %v418_v23, %v418_v23  ;;  %v425_v36 = vunpack.c.l.bf16 %v514_v30 }
  0x1b   :  { %v162_v45 = vadd.f32 %v397_v37, %v161_v41  ;;  %v294_v53 = vadd.f32 %v293_v48, %v231_v43  ;;  %v244_v37 = vmul.f32 %v421_v27, %v421_v27  ;;  %v426_v41 = vunpack.c.h.bf16 %v514_v30  ;;  %v516_v48 = vld [vmem:[#allocation2 + $0x70] sm:$0xff]  }
  0x1d   :  { %v163_v50 = vadd.f32 %v398_v42, %v162_v45  ;;  %v295_v57 = vadd.f32 %v294_v53, %v232_v47  ;;  %v245_v42 = vmul.f32 %v422_v32, %v422_v32  ;;  %v429_v45 = vunpack.c.l.bf16 %v515_v39 }
  0x1f   :  { %v164_v54 = vadd.f32 %v401_v46, %v163_v50  ;;  %v296_v62 = vadd.f32 %v295_v57, %v233_v52  ;;  %v246_v46 = vmul.f32 %v425_v36, %v425_v36  ;;  %v430_v50 = vunpack.c.h.bf16 %v515_v39  ;;  %v517_v57 = vld [vmem:[#allocation2 + $0x78] sm:$0xff]  }
  0x21   :  { %v165_v59 = vadd.f32 %v402_v51, %v164_v54  ;;  %v297_v2 = vadd.f32 %v296_v62, %v234_v56  ;;  %v247_v51 = vmul.f32 %v426_v41, %v426_v41  ;;  %v433_v54 = vunpack.c.l.bf16 %v516_v48 }
  0x23   :  { %v166_v63 = vadd.f32 %v405_v55, %v165_v59  ;;  %v298_v7 = vadd.f32 %v297_v2, %v235_v61  ;;  %v248_v55 = vmul.f32 %v429_v45, %v429_v45  ;;  %v434_v59 = vunpack.c.h.bf16 %v516_v48  ;;  %v518_v2 = vld [vmem:[#allocation2 + $0x80] sm:$0xff]  }
  0x25   :  { %v167_v4 = vadd.f32 %v406_v60, %v166_v63  ;;  %v299_v11 = vadd.f32 %v298_v7, %v236_v1  ;;  %v249_v60 = vmul.f32 %v430_v50, %v430_v50  ;;  %v437_v63 = vunpack.c.l.bf16 %v517_v57 }
  0x27   :  { %v168_v8 = vadd.f32 %v409_v0, %v167_v4  ;;  %v300_v16 = vadd.f32 %v299_v11, %v237_v6  ;;  %v250_v0 = vmul.f32 %v433_v54, %v433_v54  ;;  %v438_v4 = vunpack.c.h.bf16 %v517_v57  ;;  %v519_v11 = vld [vmem:[#allocation2 + $0x88] sm:$0xff]  }
  0x29   :  { %v169_v13 = vadd.f32 %v410_v5, %v168_v8  ;;  %v301_v20 = vadd.f32 %v300_v16, %v238_v10  ;;  %v251_v5 = vmul.f32 %v434_v59, %v434_v59  ;;  %v441_v8 = vunpack.c.l.bf16 %v518_v2 }
  0x2b   :  { %v170_v17 = vadd.f32 %v413_v9, %v169_v13  ;;  %v302_v25 = vadd.f32 %v301_v20, %v239_v15  ;;  %v252_v9 = vmul.f32 %v437_v63, %v437_v63  ;;  %v442_v13 = vunpack.c.h.bf16 %v518_v2  ;;  %v520_v20 = vld [vmem:[#allocation2 + $0x90] sm:$0xff]  }
  0x2d   :  { %v171_v22 = vadd.f32 %v414_v14, %v170_v17  ;;  %v303_v29 = vadd.f32 %v302_v25, %v240_v19  ;;  %v253_v14 = vmul.f32 %v438_v4, %v438_v4  ;;  %v445_v17 = vunpack.c.l.bf16 %v519_v11 }
  0x2f   :  { %v172_v26 = vadd.f32 %v417_v18, %v171_v22  ;;  %v304_v34 = vadd.f32 %v303_v29, %v241_v24  ;;  %v254_v18 = vmul.f32 %v441_v8, %v441_v8  ;;  %v446_v22 = vunpack.c.h.bf16 %v519_v11  ;;  %v521_v29 = vld [vmem:[#allocation2 + $0x98] sm:$0xff]  }
  0x31   :  { %v173_v31 = vadd.f32 %v418_v23, %v172_v26  ;;  %v305_v38 = vadd.f32 %v304_v34, %v242_v28  ;;  %v255_v23 = vmul.f32 %v442_v13, %v442_v13  ;;  %v449_v26 = vunpack.c.l.bf16 %v520_v20 }
  0x33   :  { %v174_v35 = vadd.f32 %v421_v27, %v173_v31  ;;  %v306_v43 = vadd.f32 %v305_v38, %v243_v33  ;;  %v256_v27 = vmul.f32 %v445_v17, %v445_v17  ;;  %v450_v31 = vunpack.c.h.bf16 %v520_v20  ;;  %v522_v38 = vld [vmem:[#allocation2 + $0xa0] sm:$0xff]  }
  0x35   :  { %v175_v40 = vadd.f32 %v422_v32, %v174_v35  ;;  %v307_v47 = vadd.f32 %v306_v43, %v244_v37  ;;  %v257_v32 = vmul.f32 %v446_v22, %v446_v22  ;;  %v453_v35 = vunpack.c.l.bf16 %v521_v29 }
  0x37   :  { %v176_v44 = vadd.f32 %v425_v36, %v175_v40  ;;  %v308_v52 = vadd.f32 %v307_v47, %v245_v42  ;;  %v258_v36 = vmul.f32 %v449_v26, %v449_v26  ;;  %v454_v40 = vunpack.c.h.bf16 %v521_v29  ;;  %v523_v47 = vld [vmem:[#allocation2 + $0xa8] sm:$0xff]  }
  0x39   :  { %v177_v49 = vadd.f32 %v426_v41, %v176_v44  ;;  %v309_v56 = vadd.f32 %v308_v52, %v246_v46  ;;  %v259_v41 = vmul.f32 %v450_v31, %v450_v31  ;;  %v457_v44 = vunpack.c.l.bf16 %v522_v38 }
  0x3b   :  { %v178_v53 = vadd.f32 %v429_v45, %v177_v49  ;;  %v310_v61 = vadd.f32 %v309_v56, %v247_v51  ;;  %v260_v45 = vmul.f32 %v453_v35, %v453_v35  ;;  %v458_v49 = vunpack.c.h.bf16 %v522_v38  ;;  %v524_v56 = vld [vmem:[#allocation2 + $0xb0] sm:$0xff]  }
  0x3d   :  { %v179_v58 = vadd.f32 %v430_v50, %v178_v53  ;;  %v311_v1 = vadd.f32 %v310_v61, %v248_v55  ;;  %v261_v50 = vmul.f32 %v454_v40, %v454_v40  ;;  %v461_v53 = vunpack.c.l.bf16 %v523_v47 }
  0x3f   :  { %v180_v62 = vadd.f32 %v433_v54, %v179_v58  ;;  %v312_v6 = vadd.f32 %v311_v1, %v249_v60  ;;  %v262_v54 = vmul.f32 %v457_v44, %v457_v44  ;;  %v462_v58 = vunpack.c.h.bf16 %v523_v47  ;;  %v525_v1 = vld [vmem:[#allocation2 + $0xb8] sm:$0xff]  }
  0x41   :  { %v181_v3 = vadd.f32 %v434_v59, %v180_v62  ;;  %v313_v10 = vadd.f32 %v312_v6, %v250_v0  ;;  %v263_v59 = vmul.f32 %v458_v49, %v458_v49  ;;  %v465_v62 = vunpack.c.l.bf16 %v524_v56 }
  0x43   :  { %v182_v7 = vadd.f32 %v437_v63, %v181_v3  ;;  %v314_v15 = vadd.f32 %v313_v10, %v251_v5  ;;  %v264_v63 = vmul.f32 %v461_v53, %v461_v53  ;;  %v466_v3 = vunpack.c.h.bf16 %v524_v56  ;;  %v526_v10 = vld [vmem:[#allocation2 + $0xc0] sm:$0xff]  }
  0x45   :  { %v183_v12 = vadd.f32 %v438_v4, %v182_v7  ;;  %v315_v19 = vadd.f32 %v314_v15, %v252_v9  ;;  %v265_v4 = vmul.f32 %v462_v58, %v462_v58  ;;  %v469_v7 = vunpack.c.l.bf16 %v525_v1 }
  0x47   :  { %v184_v16 = vadd.f32 %v441_v8, %v183_v12  ;;  %v316_v24 = vadd.f32 %v315_v19, %v253_v14  ;;  %v266_v8 = vmul.f32 %v465_v62, %v465_v62  ;;  %v470_v12 = vunpack.c.h.bf16 %v525_v1  ;;  %v527_v19 = vld [vmem:[#allocation2 + $0xc8] sm:$0xff]  }
  0x49   :  { %v185_v21 = vadd.f32 %v442_v13, %v184_v16  ;;  %v317_v28 = vadd.f32 %v316_v24, %v254_v18  ;;  %v267_v13 = vmul.f32 %v466_v3, %v466_v3  ;;  %v473_v16 = vunpack.c.l.bf16 %v526_v10 }
  0x4b   :  { %v186_v25 = vadd.f32 %v445_v17, %v185_v21  ;;  %v318_v33 = vadd.f32 %v317_v28, %v255_v23  ;;  %v268_v17 = vmul.f32 %v469_v7, %v469_v7  ;;  %v474_v21 = vunpack.c.h.bf16 %v526_v10  ;;  %v528_v28 = vld [vmem:[#allocation2 + $0xd0] sm:$0xff]  }
  0x4d   :  { %v187_v30 = vadd.f32 %v446_v22, %v186_v25  ;;  %v319_v37 = vadd.f32 %v318_v33, %v256_v27  ;;  %v269_v22 = vmul.f32 %v470_v12, %v470_v12  ;;  %v477_v25 = vunpack.c.l.bf16 %v527_v19 }
  0x4f   :  { %v188_v34 = vadd.f32 %v449_v26, %v187_v30  ;;  %v320_v42 = vadd.f32 %v319_v37, %v257_v32  ;;  %v270_v26 = vmul.f32 %v473_v16, %v473_v16  ;;  %v478_v30 = vunpack.c.h.bf16 %v527_v19  ;;  %v529_v37 = vld [vmem:[#allocation2 + $0xd8] sm:$0xff]  }
  0x51   :  { %v189_v39 = vadd.f32 %v450_v31, %v188_v34  ;;  %v321_v46 = vadd.f32 %v320_v42, %v258_v36  ;;  %v271_v31 = vmul.f32 %v474_v21, %v474_v21  ;;  %v481_v34 = vunpack.c.l.bf16 %v528_v28 }
  0x53   :  { %v190_v43 = vadd.f32 %v453_v35, %v189_v39  ;;  %v322_v51 = vadd.f32 %v321_v46, %v259_v41  ;;  %v272_v35 = vmul.f32 %v477_v25, %v477_v25  ;;  %v482_v39 = vunpack.c.h.bf16 %v528_v28  ;;  %v530_v46 = vld [vmem:[#allocation2 + $0xe0] sm:$0xff]  }
  0x55   :  { %v191_v48 = vadd.f32 %v454_v40, %v190_v43  ;;  %v323_v55 = vadd.f32 %v322_v51, %v260_v45  ;;  %v273_v40 = vmul.f32 %v478_v30, %v478_v30  ;;  %v485_v43 = vunpack.c.l.bf16 %v529_v37 }
  0x57   :  { %v192_v52 = vadd.f32 %v457_v44, %v191_v48  ;;  %v324_v60 = vadd.f32 %v323_v55, %v261_v50  ;;  %v274_v44 = vmul.f32 %v481_v34, %v481_v34  ;;  %v486_v48 = vunpack.c.h.bf16 %v529_v37  ;;  %v531_v55 = vld [vmem:[#allocation2 + $0xe8] sm:$0xff]  }
  0x59   :  { %v193_v57 = vadd.f32 %v458_v49, %v192_v52  ;;  %v325_v0 = vadd.f32 %v324_v60, %v262_v54  ;;  %v275_v49 = vmul.f32 %v482_v39, %v482_v39  ;;  %v489_v52 = vunpack.c.l.bf16 %v530_v46 }
  0x5b   :  { %v194_v61 = vadd.f32 %v461_v53, %v193_v57  ;;  %v326_v5 = vadd.f32 %v325_v0, %v263_v59  ;;  %v276_v53 = vmul.f32 %v485_v43, %v485_v43  ;;  %v490_v57 = vunpack.c.h.bf16 %v530_v46  ;;  %v532_v0 = vld [vmem:[#allocation2 + $0xf0] sm:$0xff]  }
  0x5d   :  { %v195_v2 = vadd.f32 %v462_v58, %v194_v61  ;;  %v327_v9 = vadd.f32 %v326_v5, %v264_v63  ;;  %v277_v58 = vmul.f32 %v486_v48, %v486_v48  ;;  %v493_v61 = vunpack.c.l.bf16 %v531_v55 }
  0x5f   :  { %v196_v6 = vadd.f32 %v465_v62, %v195_v2  ;;  %v328_v14 = vadd.f32 %v327_v9, %v265_v4  ;;  %v278_v62 = vmul.f32 %v489_v52, %v489_v52  ;;  %v494_v2 = vunpack.c.h.bf16 %v531_v55  ;;  %v533_v9 = vld [vmem:[#allocation2 + $0xf8] sm:$0xff]  }
  0x60   :  { %v502_v19 = vunpack.c.h.bf16 %v533_v9 }
  0x61   :  { %v197_v11 = vadd.f32 %v466_v3, %v196_v6  ;;  %v329_v18 = vadd.f32 %v328_v14, %v266_v8  ;;  %v279_v3 = vmul.f32 %v490_v57, %v490_v57  ;;  %v497_v6 = vunpack.c.l.bf16 %v532_v0 }
  0x63   :  { %v198_v15 = vadd.f32 %v469_v7, %v197_v11  ;;  %v330_v23 = vadd.f32 %v329_v18, %v267_v13  ;;  %v280_v7 = vmul.f32 %v493_v61, %v493_v61  ;;  %v498_v11 = vunpack.c.h.bf16 %v532_v0 }
  0x65   :  { %v199_v20 = vadd.f32 %v470_v12, %v198_v15  ;;  %v331_v27 = vadd.f32 %v330_v23, %v268_v17  ;;  %v281_v12 = vmul.f32 %v494_v2, %v494_v2  ;;  %v501_v15 = vunpack.c.l.bf16 %v533_v9 }
  0x67   :  { %v200_v24 = vadd.f32 %v473_v16, %v199_v20  ;;  %v332_v32 = vadd.f32 %v331_v27, %v269_v22  ;;  %v282_v16 = vmul.f32 %v497_v6, %v497_v6  ;;  %v283_v20 = vmul.f32 %v498_v11, %v498_v11 }
  0x68   :  { %v284_v23 = vmul.f32 %v501_v15, %v501_v15 }
  0x69   :  { %v201_v29 = vadd.f32 %v474_v21, %v200_v24  ;;  %v333_v36 = vadd.f32 %v332_v32, %v270_v26  ;;  %v285_v26 = vmul.f32 %v502_v19, %v502_v19 }
  0x6b   :  { %v202_v33 = vadd.f32 %v477_v25, %v201_v29  ;;  %v334_v41 = vadd.f32 %v333_v36, %v271_v31 }
  0x6d   :  { %v203_v38 = vadd.f32 %v478_v30, %v202_v33  ;;  %v335_v45 = vadd.f32 %v334_v41, %v272_v35 }
  0x6f   :  { %v204_v42 = vadd.f32 %v481_v34, %v203_v38  ;;  %v336_v50 = vadd.f32 %v335_v45, %v273_v40 }
  0x71   :  { %v205_v47 = vadd.f32 %v482_v39, %v204_v42  ;;  %v337_v54 = vadd.f32 %v336_v50, %v274_v44 }
  0x73   :  { %v206_v51 = vadd.f32 %v485_v43, %v205_v47  ;;  %v338_v59 = vadd.f32 %v337_v54, %v275_v49 }
  0x75   :  { %v207_v56 = vadd.f32 %v486_v48, %v206_v51  ;;  %v339_v63 = vadd.f32 %v338_v59, %v276_v53 }
  0x77   :  { %v208_v60 = vadd.f32 %v489_v52, %v207_v56  ;;  %v340_v4 = vadd.f32 %v339_v63, %v277_v58 }
  0x79   :  { %v209_v1 = vadd.f32 %v490_v57, %v208_v60  ;;  %v341_v8 = vadd.f32 %v340_v4, %v278_v62 }
  0x7b   :  { %v210_v5 = vadd.f32 %v493_v61, %v209_v1  ;;  %v342_v13 = vadd.f32 %v341_v8, %v279_v3 }
  0x7d   :  { %v211_v10 = vadd.f32 %v494_v2, %v210_v5  ;;  %v343_v17 = vadd.f32 %v342_v13, %v280_v7 }
  0x7f   :  { %v212_v14 = vadd.f32 %v497_v6, %v211_v10  ;;  %v344_v21 = vadd.f32 %v343_v17, %v281_v12 }
  0x81   :  { %v213_v18 = vadd.f32 %v498_v11, %v212_v14  ;;  %v345_v24 = vadd.f32 %v344_v21, %v282_v16 }
  0x83   :  { %v214_v22 = vadd.f32 %v501_v15, %v213_v18  ;;  %v346_v27 = vadd.f32 %v345_v24, %v283_v20 }
  0x85   :  { %v215_v25 = vadd.f32 %v502_v19, %v214_v22  ;;  %v347_v29 = vadd.f32 %v346_v27, %v284_v23 }
  0x87   :  { %v216_v28 = vrot.slane %v215_v25, 4  ;;  %v348_v31 = vadd.f32 %v347_v29, %v285_v26 }
  0x89   :  { %v217_v30 = vadd.f32 %v216_v28, %v215_v25  ;;  %v349_v33 = vrot.slane %v348_v31, 4 }
  0x8b   :  { %v218_v32 = vrot.slane %v217_v30, 2  ;;  %v350_v35 = vadd.f32 %v349_v33, %v348_v31 }
  0x8d   :  { %v219_v34 = vadd.f32 %v218_v32, %v217_v30  ;;  %v351_v37 = vrot.slane %v350_v35, 2 }
  0x8f   :  { %v220_v36 = vrot.slane %v219_v34, 1  ;;  %v352_v38 = vadd.f32 %v351_v37, %v350_v35 }
  0x91   :  { %v221_v39 = vadd.f32 %v220_v36, %v219_v34  ;;  %v353_v40 = vrot.slane %v352_v38, 1 }
  0x93   :  { %v354_v41 = vadd.f32 %v353_v40, %v352_v38 }
  0x95   :  { %v356_v42 = vsel %vm355_vm0, %v221_v39, %v354_v41 }
  0x96   :  { %357 = vst [vmem:[#allocation5] sm:$0x3] %v356_v42 }
  0x97   :  { %368 = dma.vmem_to_hbm [thread:$0]  %s364_s13, 32, %s366_s16, [#allocation4]  }
  0x98   :  { %588 = dma.done.wait [#allocation4], 32  }
  0x99   :  { %589 = vsyncadd [#allocation4], 4294967264 }
  0x9a   :  { %373 = vsyncpa [#allocation3], 1 }
  0x9b   :  { %374 = vsyncpa [#allocation4], 1 }

</bundles_post_ra>
